<compile_context>
chip_gen: v5e
topology: v5e:2x2
jax: 0.10.0
libtpu: 0.0.40
codegen_flags: <defaults>
</compile_context>

<pallas_src>
import functools

import jax
import jax.numpy as jnp
from jax.experimental import pallas as pl
from jax.experimental.pallas import tpu as pltpu


def _merge_dma_kernel(x1_hbm, x2_hbm, o_hbm, sem, *, f1, f2):
    # Two independent DMA descriptors:
    #   x1f -> out[:, :f1]        (contiguous src, strided dst rows)
    #   x2f -> out[:, f1:f1+f2]   (contiguous src, strided dst rows)
    # Start both, then wait on both; no vector loads/stores are emitted.
    cp1 = pltpu.make_async_copy(x1_hbm, o_hbm.at[:, pl.ds(0, f1)], sem.at[0])
    cp2 = pltpu.make_async_copy(x2_hbm, o_hbm.at[:, pl.ds(f1, f2)], sem.at[1])
    cp1.start()
    cp2.start()
    cp1.wait()
    cp2.wait()


def merge(x1, x2):
    """Pallas equivalent of Merge.forward(X1, X2)."""
    assert x1.shape[0] == x2.shape[0], "batch dims must match"
    assert x1.dtype == x2.dtype, "dtypes must match"
    n = x1.shape[0]

    # Glue: torch .view(N, -1) on a contiguous NCHW tensor == row-major reshape.
    x1f = x1.reshape(n, -1)
    x2f = x2.reshape(n, -1)
    f1 = x1f.shape[1]
    f2 = x2f.shape[1]
    out_dtype = x1f.dtype
    itemsize = jnp.dtype(out_dtype).itemsize

    # TODO(synk): the larger end-to-end win is to never materialize this concat
    # and instead fuse it into the downstream FC layer (X1f@W1 + X2f@W2 into a
    # shared accumulator); that changes the module boundary, so it is left to
    # the caller.  Likewise, for tiny shapes a plain jnp.concatenate fused by
    # XLA is a valid alternative to this custom call.
    return pl.pallas_call(
        functools.partial(_merge_dma_kernel, f1=f1, f2=f2),
        out_shape=jax.ShapeDtypeStruct((n, f1 + f2), out_dtype),
        in_specs=[
            pl.BlockSpec(memory_space=pl.ANY),   # x1f stays in HBM, no auto-DMA
            pl.BlockSpec(memory_space=pl.ANY),   # x2f stays in HBM, no auto-DMA
        ],
        out_specs=pl.BlockSpec(memory_space=pl.ANY),  # output written by DMA only
        scratch_shapes=[pltpu.SemaphoreType.DMA((2,))],
        cost_estimate=pl.CostEstimate(
            flops=0,
            transcendentals=0,
            bytes_accessed=2 * n * (f1 + f2) * itemsize,  # read + write
        ),
    )(x1f, x2f)


if __name__ == "__main__":
    key = jax.random.PRNGKey(0)
    k1, k2 = jax.random.split(key)

    # Two NCHW feature maps with the same batch size (the two conv branches in
    # the DDH paper before the merged layer).
    x1 = jax.random.normal(k1, (2, 4, 16, 16), dtype=jnp.float32)  # flatten -> (2, 1024)
    x2 = jax.random.normal(k2, (2, 4, 8, 8), dtype=jnp.float32)    # flatten -> (2, 256)

    out = jax.block_until_ready(merge(x1, x2))

    # Reference: flatten + concat in plain JAX (mirrors the torch module).
    ref = jnp.concatenate(
        [x1.reshape(x1.shape[0], -1), x2.reshape(x2.shape[0], -1)], axis=1
    )
    assert out.shape == ref.shape, (out.shape, ref.shape)
    assert jnp.array_equal(out, ref), "Pallas merge mismatch vs reference"

    print("KERNEL_OK")
</pallas_src>

<mosaic_0001>
module attributes {stable_mosaic.version = 11 : i64} {
  func.func @_merge_dma_kernel(%arg0: memref<2x1024xf32, #tpu.memory_space<any>>, %arg1: memref<2x256xf32, #tpu.memory_space<any>>, %arg2: memref<2x1280xf32, #tpu.memory_space<any>>, %arg3: memref<2x!tpu.dma_semaphore, #tpu.memory_space<semaphore_mem>>) attributes {dimension_semantics = [], scalar_prefetch = 0 : i64, scratch_operands = 1 : i64, tpu.core_type = #tpu.core_type<tc>} {
    %c0_i32 = arith.constant 0 : i32
    %c0_i32_0 = arith.constant 0 : i32
    %c0_i32_1 = arith.constant 0 : i32
    %0 = tpu.memref_slice %arg2[%c0_i32_0, %c0_i32_1] : memref<2x1280xf32, #tpu.memory_space<any>> -> memref<2x1024xf32, #tpu.memory_space<any>>
    %1 = tpu.memref_slice %arg3[%c0_i32] : memref<2x!tpu.dma_semaphore, #tpu.memory_space<semaphore_mem>> -> memref<1x!tpu.dma_semaphore, #tpu.memory_space<semaphore_mem>>
    %2 = tpu.memref_squeeze %1 : memref<1x!tpu.dma_semaphore, #tpu.memory_space<semaphore_mem>> -> memref<!tpu.dma_semaphore, #tpu.memory_space<semaphore_mem>>
    tpu.enqueue_dma source(%arg0 : memref<2x1024xf32, #tpu.memory_space<any>>) target(%0 : memref<2x1024xf32, #tpu.memory_space<any>>) target_semaphore(%2 : memref<!tpu.dma_semaphore, #tpu.memory_space<semaphore_mem>>)
    %c1_i32 = arith.constant 1 : i32
    %c0_i32_2 = arith.constant 0 : i32
    %c1024_i32 = arith.constant 1024 : i32
    %3 = tpu.memref_slice %arg2[%c0_i32_2, %c1024_i32] : memref<2x1280xf32, #tpu.memory_space<any>> -> memref<2x256xf32, #tpu.memory_space<any>>
    %4 = tpu.memref_slice %arg3[%c1_i32] : memref<2x!tpu.dma_semaphore, #tpu.memory_space<semaphore_mem>> -> memref<1x!tpu.dma_semaphore, #tpu.memory_space<semaphore_mem>>
    %5 = tpu.memref_squeeze %4 : memref<1x!tpu.dma_semaphore, #tpu.memory_space<semaphore_mem>> -> memref<!tpu.dma_semaphore, #tpu.memory_space<semaphore_mem>>
    tpu.enqueue_dma source(%arg1 : memref<2x256xf32, #tpu.memory_space<any>>) target(%3 : memref<2x256xf32, #tpu.memory_space<any>>) target_semaphore(%5 : memref<!tpu.dma_semaphore, #tpu.memory_space<semaphore_mem>>)
    %c0_i32_3 = arith.constant 0 : i32
    %c0_i32_4 = arith.constant 0 : i32
    %c0_i32_5 = arith.constant 0 : i32
    %6 = tpu.memref_slice %arg2[%c0_i32_4, %c0_i32_5] : memref<2x1280xf32, #tpu.memory_space<any>> -> memref<2x1024xf32, #tpu.memory_space<any>>
    %7 = tpu.memref_slice %arg3[%c0_i32_3] : memref<2x!tpu.dma_semaphore, #tpu.memory_space<semaphore_mem>> -> memref<1x!tpu.dma_semaphore, #tpu.memory_space<semaphore_mem>>
    %8 = tpu.memref_squeeze %7 : memref<1x!tpu.dma_semaphore, #tpu.memory_space<semaphore_mem>> -> memref<!tpu.dma_semaphore, #tpu.memory_space<semaphore_mem>>
    tpu.wait_dma2 semaphore(%8 : memref<!tpu.dma_semaphore, #tpu.memory_space<semaphore_mem>>) src(%arg0 : memref<2x1024xf32, #tpu.memory_space<any>>) dst(%6 : memref<2x1024xf32, #tpu.memory_space<any>>)
    %c1_i32_6 = arith.constant 1 : i32
    %c0_i32_7 = arith.constant 0 : i32
    %c1024_i32_8 = arith.constant 1024 : i32
    %9 = tpu.memref_slice %arg2[%c0_i32_7, %c1024_i32_8] : memref<2x1280xf32, #tpu.memory_space<any>> -> memref<2x256xf32, #tpu.memory_space<any>>
    %10 = tpu.memref_slice %arg3[%c1_i32_6] : memref<2x!tpu.dma_semaphore, #tpu.memory_space<semaphore_mem>> -> memref<1x!tpu.dma_semaphore, #tpu.memory_space<semaphore_mem>>
    %11 = tpu.memref_squeeze %10 : memref<1x!tpu.dma_semaphore, #tpu.memory_space<semaphore_mem>> -> memref<!tpu.dma_semaphore, #tpu.memory_space<semaphore_mem>>
    tpu.wait_dma2 semaphore(%11 : memref<!tpu.dma_semaphore, #tpu.memory_space<semaphore_mem>>) src(%arg1 : memref<2x256xf32, #tpu.memory_space<any>>) dst(%9 : memref<2x256xf32, #tpu.memory_space<any>>)
    return
  }
}

</mosaic_0001>

<bundles_post_ra>
// kernel: tpu_custom_call.1
= control target key start
LH: loop header
LB: loop body
LE: loop exit
PB: predicated region body
PF: predicated region fallthrough
CT: control target
= control target key end

     0   :  { %s62_s18 = smov [#allocation2]   ;;  %s63_s19 = smov [#allocation3]   ;;  %s94_s0 = inlined_call_operand.hbm [shape: f32[2,1024], index: 0, kind: input, shape index: {}]   ;;  %s95_s2 = inlined_call_operand.hbm [shape: f32[2,1280], index: 2, kind: output, shape index: {}]   ;;  %s96_s1 = inlined_call_operand.hbm [shape: f32[2,256], index: 1, kind: input, shape index: {}]  }
   0x1   :  { %s11_s11 = sshll.u32 %s94_s0, 4  ;;  %s13_s14 = sshll.u32 %s95_s2, 4  ;;  %s12_s11 = int_to_ptr.hbm [resolvable:$true] %s11_s11  ;;  %s14_s14 = int_to_ptr.hbm [resolvable:$true] %s13_s14 }
   0x2   :  { %s18_s17 = scalar_lea.hbm %s95_s2, 16  ;;  %s64_s20 = smov 0  }
   0x3   :  { %17 = dma.general %s12_s11, 256, %s14_s14, %s62_s18, %s63_s19, [#allocation4], %s64_s20, 0  }
   0x4   :  { %s26_s21 = sshll.u32 %s18_s17, 4  ;;  %s24_s24 = sshll.u32 %s96_s1, 4  ;;  %s25_s24 = int_to_ptr.hbm [resolvable:$true] %s24_s24  ;;  %s27_s21 = int_to_ptr.hbm [resolvable:$true] %s26_s21 }
   0x5   :  { %s65_s0 = smov [#allocation2 + $0x1]   ;;  %s66_s25 = smov [#allocation5]  }
   0x6   :  { %30 = dma.general %s25_s24, 64, %s27_s21, %s65_s0, %s66_s25, [#allocation6], %s64_s20, 0  }
   0x7   :  { %58 = dma.done.wait [#allocation2], 256 }
   0x8   :  { %59 = vsyncadd [#allocation2], 4294967040 }
   0x9   :  { %60 = dma.done.wait [#allocation2 + $0x1], 64 }
   0xa   :  { %61 = vsyncadd [#allocation2 + $0x1], 4294967232 }
   0xb   :  { %38 = vsyncmov [#allocation2] }
   0xe   :  { %s39_s2 = vpop.sfrf %38 }
   0xf   :  { %p51_p0 = scmp.ne.s32.totalorder %s39_s2, 0 }
  0x11   :  { %43 = shalt.err (%p51_p0)  }
  0x12   :  { %45 = vsyncmov [#allocation2 + $0x1] }
  0x15   :  { %s46_s26 = vpop.sfrf %45 }
  0x16   :  { %p52_p1 = scmp.ne.s32.totalorder %s46_s26, 0 }
  0x18   :  { %50 = shalt.err (%p52_p1)  }

</bundles_post_ra>
